<compile_context>
chip_gen: v5e
topology: v5e:2x2
jax: 0.10.0
libtpu: 0.0.40
codegen_flags: <defaults>
</compile_context>

<pallas_src>
import functools

import jax
import jax.numpy as jnp
from jax.experimental import pallas as pl
from jax.experimental.pallas import tpu as pltpu


def _pool_kernel_single(x_ref, out_ref, *, hw):
    """Whole spatial extent in one block: no reduction axis, no scratch."""
    x = x_ref[...]                                               # (rows, hw)
    x_f32 = x.astype(jnp.float32)
    s = jnp.sum(x_f32, axis=-1, keepdims=True)                   # (rows, 1) f32
    m = jnp.max(x, axis=-1, keepdims=True).astype(jnp.float32)   # exact in any dtype
    avg = s / jnp.float32(hw)
    # Small sublane->lane transposes so the output block is lane-dense.
    out_ref[0:1, :] = avg.T.astype(out_ref.dtype)                # (1, rows)
    out_ref[1:2, :] = m.T.astype(out_ref.dtype)


def _pool_kernel_multi(x_ref, out_ref, sum_ref, max_ref, *, hw, tile_hw):
    """hw split across a trailing "arbitrary" grid axis; f32 running scratch."""
    k = pl.program_id(1)
    nk = pl.num_programs(1)

    @pl.when(k == 0)
    def _init():
        sum_ref[...] = jnp.zeros_like(sum_ref)
        max_ref[...] = jnp.full_like(max_ref, -jnp.inf)

    x = x_ref[...]                       # (tile_rows, tile_hw), input dtype
    x_f32 = x.astype(jnp.float32)

    def _accumulate(xs_f32, xm):
        sum_ref[...] += jnp.sum(xs_f32, axis=-1, keepdims=True)
        max_ref[...] = jnp.maximum(
            max_ref[...],
            jnp.max(xm, axis=-1, keepdims=True).astype(jnp.float32),
        )

    if hw % tile_hw != 0:
        # Only the LAST hw block can be ragged: keep the steady-state stream
        # unmasked (extra VPU ops per streamed vreg would bind on v7x) and
        # mask exclusively on the final block.
        @pl.when(k < nk - 1)
        def _steady():
            _accumulate(x_f32, x)

        @pl.when(k == nk - 1)
        def _ragged():
            col = jax.lax.broadcasted_iota(jnp.int32, x.shape, 1) + k * tile_hw
            valid = col < hw
            xs = jnp.where(valid, x_f32, 0.0)
            xm = jnp.where(valid, x, jnp.finfo(x.dtype).min)
            _accumulate(xs, xm)
    else:
        _accumulate(x_f32, x)

    @pl.when(k == nk - 1)
    def _finalize():
        avg = sum_ref[...] / jnp.float32(hw)     # (tile_rows, 1) f32
        mx = max_ref[...]
        out_ref[0:1, :] = avg.T.astype(out_ref.dtype)
        out_ref[1:2, :] = mx.T.astype(out_ref.dtype)


def adaptive_concat_pool2d(x: jax.Array) -> jax.Array:
    """AdaptiveConcatPool2d forward: (N, C, H, W) -> (N, 2*C, 1, 1)."""
    n, c, h, w = x.shape
    nc = n * c
    hw = h * w
    dtype = x.dtype
    itemsize = jnp.dtype(dtype).itemsize

    # Free reshape for contiguous NCHW: rows = (n, c) maps, cols = spatial.
    x2d = x.reshape(nc, hw)

    # ---- VMEM budget (capacity-derived: v7x 64 MiB vs v5e/v6e 128 MiB) -----
    try:
        vmem_cap = int(pltpu.get_tpu_info().vmem_capacity_bytes)
    except Exception:
        vmem_cap = 64 * 1024 * 1024          # conservative fallback, safe everywhere
    # Budget for ONE input block (pipeline double-buffers -> 2x in flight).
    vmem_input_budget = min(32 * 1024 * 1024, vmem_cap // 4)
    elems_budget = max(128 * 128, vmem_input_budget // itemsize)

    # ---- Tile selection: pick tile_hw FIRST ---------------------------------
    # Prefer tile_hw == hw: one fully contiguous HBM run per block, no
    # reduction grid axis, no ragged-hw mask, no scratch RMW.
    fit_rows = nc if nc < 256 else 128
    if fit_rows * hw <= elems_budget or hw <= 128:
        tile_hw = hw
    else:
        tile_hw = max(128, ((elems_budget // fit_rows) // 128) * 128)

    # Row tile: multiple of 128 (lane-dense (2, tile_rows) output block); for
    # nc >= 256 keep at least 2 row blocks so v7x's two TensorCores both work.
    if nc < 256:
        tile_rows = nc                        # block == full dim is always legal
    else:
        cap_rows = max(128, ((elems_budget // tile_hw) // 128) * 128)
        half_rows = ((pl.cdiv(nc, 2) + 127) // 128) * 128   # ~nc/2, 128-aligned
        tile_rows = max(128, min(1024, cap_rows, half_rows))

    row_blocks = pl.cdiv(nc, tile_rows)
    hw_blocks = pl.cdiv(hw, tile_hw)

    vmem_limit = int(
        min(vmem_cap * 3 // 4,
            max(32 * 1024 * 1024,
                2 * tile_rows * tile_hw * itemsize + (16 << 20)))
    )

    if hw_blocks == 1:
        kernel = functools.partial(_pool_kernel_single, hw=hw)
        grid = (row_blocks,)
        in_specs = [pl.BlockSpec((tile_rows, hw), lambda i: (i, 0))]
        out_specs = pl.BlockSpec((2, tile_rows), lambda i: (0, i))
        scratch_shapes = []
        dims = ("parallel",)
    else:
        kernel = functools.partial(_pool_kernel_multi, hw=hw, tile_hw=tile_hw)
        grid = (row_blocks, hw_blocks)
        in_specs = [pl.BlockSpec((tile_rows, tile_hw), lambda i, k: (i, k))]
        out_specs = pl.BlockSpec((2, tile_rows), lambda i, k: (0, i))
        scratch_shapes = [
            pltpu.VMEM((tile_rows, 1), jnp.float32),   # running sum
            pltpu.VMEM((tile_rows, 1), jnp.float32),   # running max
        ]
        dims = ("parallel", "arbitrary")

    out = pl.pallas_call(
        kernel,
        out_shape=jax.ShapeDtypeStruct((2, nc), dtype),
        grid_spec=pltpu.PrefetchScalarGridSpec(
            num_scalar_prefetch=0,
            grid=grid,
            in_specs=in_specs,
            out_specs=out_specs,
            scratch_shapes=scratch_shapes,
        ),
        compiler_params=pltpu.CompilerParams(
            dimension_semantics=dims,
            vmem_limit_bytes=vmem_limit,
        ),
    )(x2d)

    # out[0] = per-(n,c) avg, out[1] = per-(n,c) max.
    # (2, nc) -> (n, 2c, 1, 1): avg channels first, then max channels
    # (matches torch.cat([avgpool(x), maxpool(x)], dim=1)).
    return out.reshape(2, n, c).transpose(1, 0, 2).reshape(n, 2 * c, 1, 1)


if __name__ == "__main__":
    key = jax.random.PRNGKey(0)
    # Small NCHW input consistent with the module's forward.
    x = jax.random.normal(key, (2, 4, 16, 16), dtype=jnp.float32)

    fn = jax.jit(adaptive_concat_pool2d)
    out = jax.block_until_ready(fn(x))

    # Reference (same semantics as the PyTorch module).
    ref = jnp.concatenate(
        [
            jnp.mean(x, axis=(2, 3), keepdims=True),
            jnp.max(x, axis=(2, 3), keepdims=True),
        ],
        axis=1,
    )
    assert out.shape == (2, 8, 1, 1), out.shape
    assert jnp.allclose(out, ref, atol=1e-5, rtol=1e-5)
    print("KERNEL_OK")
</pallas_src>

<mosaic_0001>
module attributes {stable_mosaic.version = 11 : i64} {
  func.func @_pool_kernel_single(%arg0: i32, %arg1: memref<8x256xf32, #tpu.memory_space<vmem>>, %arg2: memref<2x8xf32, #tpu.memory_space<vmem>>) attributes {dimension_semantics = [#tpu.dimension_semantics<parallel>], iteration_bounds = array<i64: 1>, scalar_prefetch = 0 : i64, scratch_operands = 0 : i64, tpu.core_type = #tpu.core_type<tc>, window_params = [{transform_indices = @transform_0, window_bounds = array<i64: 8, 256>}, {transform_indices = @transform_1, window_bounds = array<i64: 2, 8>}]} {
    %c0 = arith.constant 0 : index
    %c0_0 = arith.constant 0 : index
    %0 = vector.load %arg1[%c0, %c0_0] : memref<8x256xf32, #tpu.memory_space<vmem>>, vector<8x256xf32>
    %cst = arith.constant dense<0.000000e+00> : vector<8xf32>
    %1 = vector.multi_reduction <add>, %0, %cst [1] : vector<8x256xf32> to vector<8xf32>
    %2 = vector.shape_cast %1 : vector<8xf32> to vector<8x1xf32>
    %cst_1 = arith.constant dense<0xFF800000> : vector<8xf32>
    %3 = vector.multi_reduction <maximumf>, %0, %cst_1 [1] : vector<8x256xf32> to vector<8xf32>
    %4 = vector.shape_cast %3 : vector<8xf32> to vector<8x1xf32>
    %cst_2 = arith.constant 2.560000e+02 : f32
    %5 = vector.broadcast %cst_2 : f32 to vector<8x1xf32>
    %6 = arith.divf %2, %5 : vector<8x1xf32>
    %7 = tpu.transpose %6, [1, 0] : vector<8x1xf32> -> vector<1x8xf32>
    %c0_3 = arith.constant 0 : index
    %c0_4 = arith.constant 0 : index
    %8 = vector.load %arg2[%c0_3, %c0_4] : memref<2x8xf32, #tpu.memory_space<vmem>>, vector<1x8xf32>
    tpu.vector_store %arg2[%c0_3, %c0_4], %7 {strides = array<i32>} : memref<2x8xf32, #tpu.memory_space<vmem>>, vector<1x8xf32>,
    %9 = tpu.transpose %4, [1, 0] : vector<8x1xf32> -> vector<1x8xf32>
    %c1 = arith.constant 1 : index
    %c0_5 = arith.constant 0 : index
    %10 = vector.load %arg2[%c1, %c0_5] : memref<2x8xf32, #tpu.memory_space<vmem>>, vector<1x8xf32>
    tpu.vector_store %arg2[%c1, %c0_5], %9 {strides = array<i32>} : memref<2x8xf32, #tpu.memory_space<vmem>>, vector<1x8xf32>,
    return
  }
  func.func @transform_0(%arg0: i32) -> (i32, i32) {
    %c0_i32 = arith.constant 0 : i32
    %c0_i32_0 = arith.constant 0 : i32
    return %arg0, %c0_i32 : i32, i32
  }
  func.func @transform_1(%arg0: i32) -> (i32, i32) {
    %c0_i32 = arith.constant 0 : i32
    %c0_i32_0 = arith.constant 0 : i32
    return %c0_i32, %arg0 : i32, i32
  }
}

</mosaic_0001>

<bundles_post_ra>
// kernel: adaptive_concat_pool2d.1
= control target key start
LH: loop header
LB: loop body
LE: loop exit
PB: predicated region body
PF: predicated region fallthrough
CT: control target
= control target key end

     0   :  { %v99_v4 = vmov 256.0   ;;  %vm56_vm1 = vcmask 57344   ;;  %s122_s0 = inlined_call_operand.vmem [shape: f32[8,256], index: 0, kind: input, shape index: {}]   ;;  %s123_s1 = inlined_call_operand.vmem [shape: f32[2,8], index: 1, kind: output, shape index: {}]  }
   0x1   :  { %v8_v0 = vld [vmem:[%s122_s0] sm:$0xff]  ;;  %v9_v1 = vld [vmem:[%s122_s0 + $0x8] sm:$0xff]  ;;  %97 = vrcp.f32 %v99_v4 }
   0x2   :  { %v10_v2 = vadd.f32 %v9_v1, %v8_v0  ;;  %v13_v3 = vmax.f32 %v8_v0, %v9_v1 }
   0x4   :  { %11 = vadd.xlane.f32.xlu0 %v10_v2 }
   0x7   :  { %v98_v5 = vpop.eup %97 }
   0x8   :  { %v17_v6 = vmul.f32 256.0, %v98_v5  ;;  %vm21_vm0 = vweird.f32 %v98_v5 }
   0xa   :  { %v18_v7 = vsub.f32 1.0, %v17_v6 }
   0xc   :  { %14 = vmax.xlane.f32.xlu0 %v13_v3  ;;  %v19_v8 = vmul.f32 %v98_v5, %v18_v7 }
   0xe   :  { %v20_v9 = vadd.f32 %v98_v5, %v19_v8 }
  0x10   :  { %v22_v10 = vsel %vm21_vm0, %v98_v5, %v20_v9 }
  0x77   :  { %v12_v11 = vpop.xlane.xlu0 %11 }
  0x78   :  { %v23_v12 = vmul.f32 %v22_v10, %v12_v11 }
  0x7a   :  { %24 = vxpose.xlu1.b32.start.end [1/1] (short) (narrow) %v23_v12, 8 }
  0x7f   :  { %v15_v13 = vpop.xlane.xlu0 %14 }
  0x82   :  { %58 = vxpose.xlu1.b32.start.end [1/1] (short) (narrow) %v15_v13, 8 }
 0x11e   :  { %v40_v14 = vpop.trf.xlu1 }
 0x11f   :  { %57 = vst.msk [vmem:[%s123_s1] sm:$0x1] %vm56_vm1, %v40_v14 }
 0x126   :  { %v74_v15 = vpop.trf.xlu1 }
 0x127   :  { %90 = vst.msk [vmem:[%s123_s1 + $0x1] sm:$0x1] %vm56_vm1, %v74_v15 }

</bundles_post_ra>
